<compile_context>
chip_gen: v6e
topology: v6e:2x2x1
jax: 0.10.0
libtpu: 0.0.40
codegen_flags: <defaults>
</compile_context>

<pallas_src>
import functools

import jax
import jax.numpy as jnp
from jax.experimental import pallas as pl
from jax.experimental.pallas import tpu as pltpu

EPS = 1e-5

_BLOCK_BUDGET_BYTES = 2 * 1024 * 1024     # per-block f32 budget (x block)
_VMEM_LIMIT_BYTES = 48 * 1024 * 1024      # safe on v5e/v6e (128 MiB) and v7x (64 MiB)

_COMPILER_PARAMS = pltpu.CompilerParams(
    dimension_semantics=("parallel", "parallel"),
    vmem_limit_bytes=_VMEM_LIMIT_BYTES,
)


def _pick_tile(total, row_elems, unit, elem_bytes=4, budget=_BLOCK_BUDGET_BYTES):
    """Largest tile along the channel axis (multiple of `unit`, or the full axis)
    such that tile * row_elems * elem_bytes <= budget."""
    max_t = budget // max(row_elems * elem_bytes, 1)
    if max_t >= total or total <= unit:
        return total
    return max(unit, (max_t // unit) * unit)


# ----------------------------- kernels ------------------------------------ #

def _revin_norm_kernel(x_ref, w_ref, b_ref, y_ref, mean_ref, std_ref, *,
                       eps, reduce_axis):
    # x_ref is a 2-D block; reduction (the L axis) is along `reduce_axis`.
    x = x_ref[...].astype(jnp.float32)
    mean = jnp.mean(x, axis=reduce_axis, keepdims=True)
    xc = x - mean                                           # reused below
    var = jnp.mean(xc * xc, axis=reduce_axis, keepdims=True)  # population var
    stdev = jnp.sqrt(var + eps)
    inv_std = 1.0 / stdev                                   # divide only on stats
    scale = inv_std * w_ref[...].astype(jnp.float32)        # fold affine weight
    y = xc * scale + b_ref[...].astype(jnp.float32)

    y_ref[...] = y.astype(y_ref.dtype)
    mean_ref[...] = mean.astype(mean_ref.dtype)
    std_ref[...] = stdev.astype(std_ref.dtype)


def _revin_denorm_kernel(x_ref, mean_ref, std_ref, w_ref, b_ref, y_ref, *, eps):
    x = x_ref[...].astype(jnp.float32)
    w = w_ref[...].astype(jnp.float32)
    b = b_ref[...].astype(jnp.float32)
    mean = mean_ref[...].astype(jnp.float32)
    stdev = std_ref[...].astype(jnp.float32)
    # Hoisted reciprocal on the stat-sized tensor only.
    scale = stdev * (1.0 / (w + eps * eps))
    y = (x - b) * scale + mean
    y_ref[...] = y.astype(y_ref.dtype)


# ----------------------------- wrappers ------------------------------------ #

def revin_norm(x, weight, bias, eps=EPS):
    """x: (B, L, C); weight, bias: (C,). Returns (y, mean, stdev) with
    mean/stdev of shape (B, 1, C) in float32."""
    B, L, C = x.shape
    weight = weight.astype(jnp.float32)
    bias = bias.astype(jnp.float32)

    if C >= 128:
        # Native (B, L, C) layout is already lane-dense (C on lanes).
        # NOTE: the full L axis must be resident per block (needed for stats);
        # fine for typical seq lengths given the VMEM budget above.
        TC = _pick_tile(C, L, 128)
        grid = (B, pl.cdiv(C, TC))
        kernel = functools.partial(_revin_norm_kernel, eps=eps, reduce_axis=0)
        y, mean, stdev = pl.pallas_call(
            kernel,
            grid=grid,
            in_specs=[
                pl.BlockSpec((None, L, TC), lambda b, c: (b, 0, c)),
                pl.BlockSpec((1, TC), lambda b, c: (0, c)),
                pl.BlockSpec((1, TC), lambda b, c: (0, c)),
            ],
            out_specs=[
                pl.BlockSpec((None, L, TC), lambda b, c: (b, 0, c)),
                pl.BlockSpec((None, 1, TC), lambda b, c: (b, 0, c)),
                pl.BlockSpec((None, 1, TC), lambda b, c: (b, 0, c)),
            ],
            out_shape=(
                jax.ShapeDtypeStruct((B, L, C), x.dtype),
                jax.ShapeDtypeStruct((B, 1, C), jnp.float32),
                jax.ShapeDtypeStruct((B, 1, C), jnp.float32),
            ),
            compiler_params=_COMPILER_PARAMS,
        )(x, weight.reshape(1, C), bias.reshape(1, C))
        return y, mean, stdev

    # Small C: go channel-major so the (long) L axis is on the 128 lanes.
    xt = jnp.transpose(x, (0, 2, 1))                        # (B, C, L)
    TR = _pick_tile(C, L, 8)
    grid = (B, pl.cdiv(C, TR))
    kernel = functools.partial(_revin_norm_kernel, eps=eps, reduce_axis=1)
    yt, mean_t, std_t = pl.pallas_call(
        kernel,
        grid=grid,
        in_specs=[
            pl.BlockSpec((None, TR, L), lambda b, c: (b, c, 0)),
            pl.BlockSpec((TR, 1), lambda b, c: (c, 0)),
            pl.BlockSpec((TR, 1), lambda b, c: (c, 0)),
        ],
        out_specs=[
            pl.BlockSpec((None, TR, L), lambda b, c: (b, c, 0)),
            pl.BlockSpec((None, TR, 1), lambda b, c: (b, c, 0)),
            pl.BlockSpec((None, TR, 1), lambda b, c: (b, c, 0)),
        ],
        out_shape=(
            jax.ShapeDtypeStruct((B, C, L), x.dtype),
            jax.ShapeDtypeStruct((B, C, 1), jnp.float32),
            jax.ShapeDtypeStruct((B, C, 1), jnp.float32),
        ),
        compiler_params=_COMPILER_PARAMS,
    )(xt, weight.reshape(C, 1), bias.reshape(C, 1))
    y = jnp.transpose(yt, (0, 2, 1))
    mean = jnp.transpose(mean_t, (0, 2, 1))
    stdev = jnp.transpose(std_t, (0, 2, 1))
    return y, mean, stdev


def revin_denorm(x, mean, stdev, weight, bias, eps=EPS):
    """x: (B, L, C); mean/stdev: (B, 1, C) float32; weight, bias: (C,)."""
    B, L, C = x.shape
    weight = weight.astype(jnp.float32)
    bias = bias.astype(jnp.float32)
    kernel = functools.partial(_revin_denorm_kernel, eps=eps)

    if C >= 128:
        TC = _pick_tile(C, L, 128)
        grid = (B, pl.cdiv(C, TC))
        return pl.pallas_call(
            kernel,
            grid=grid,
            in_specs=[
                pl.BlockSpec((None, L, TC), lambda b, c: (b, 0, c)),
                pl.BlockSpec((None, 1, TC), lambda b, c: (b, 0, c)),
                pl.BlockSpec((None, 1, TC), lambda b, c: (b, 0, c)),
                pl.BlockSpec((1, TC), lambda b, c: (0, c)),
                pl.BlockSpec((1, TC), lambda b, c: (0, c)),
            ],
            out_specs=pl.BlockSpec((None, L, TC), lambda b, c: (b, 0, c)),
            out_shape=jax.ShapeDtypeStruct((B, L, C), x.dtype),
            compiler_params=_COMPILER_PARAMS,
        )(x, mean, stdev, weight.reshape(1, C), bias.reshape(1, C))

    xt = jnp.transpose(x, (0, 2, 1))                        # (B, C, L)
    mean_t = jnp.transpose(mean, (0, 2, 1))                 # (B, C, 1)
    std_t = jnp.transpose(stdev, (0, 2, 1))                 # (B, C, 1)
    TR = _pick_tile(C, L, 8)
    grid = (B, pl.cdiv(C, TR))
    yt = pl.pallas_call(
        kernel,
        grid=grid,
        in_specs=[
            pl.BlockSpec((None, TR, L), lambda b, c: (b, c, 0)),
            pl.BlockSpec((None, TR, 1), lambda b, c: (b, c, 0)),
            pl.BlockSpec((None, TR, 1), lambda b, c: (b, c, 0)),
            pl.BlockSpec((TR, 1), lambda b, c: (c, 0)),
            pl.BlockSpec((TR, 1), lambda b, c: (c, 0)),
        ],
        out_specs=pl.BlockSpec((None, TR, L), lambda b, c: (b, c, 0)),
        out_shape=jax.ShapeDtypeStruct((B, C, L), x.dtype),
        compiler_params=_COMPILER_PARAMS,
    )(xt, mean_t, std_t, weight.reshape(C, 1), bias.reshape(C, 1))
    return jnp.transpose(yt, (0, 2, 1))


class RevIN:
    """JAX/Pallas port of the PyTorch RevIN module (forward-pass semantics)."""

    def __init__(self, num_features, eps=EPS, affine=True):
        self.num_features = num_features
        self.eps = eps
        self.affine = affine
        # nn.Parameter(torch.ones / torch.zeros) equivalents.
        self.affine_weight = jnp.ones((num_features,), jnp.float32)
        self.affine_bias = jnp.zeros((num_features,), jnp.float32)
        self.mean = None
        self.stdev = None

    def __call__(self, x, mode="norm"):
        if mode == "norm":
            # affine=False is exactly reproduced by identity weight/bias.
            y, self.mean, self.stdev = revin_norm(
                x, self.affine_weight, self.affine_bias, self.eps)
            return y
        elif mode == "denorm":
            if self.affine:
                w, b = self.affine_weight, self.affine_bias
            else:
                # affine=False denorm: no bias subtraction / weight division.
                w = jnp.full((self.num_features,), 1.0 - self.eps * self.eps,
                             jnp.float32)
                b = jnp.zeros((self.num_features,), jnp.float32)
            return revin_denorm(x, self.mean, self.stdev, w, b, self.eps)
        else:
            raise NotImplementedError


# ----------------------------- reference / test ---------------------------- #

def _ref_norm(x, w, b, eps=EPS):
    mean = jnp.mean(x, axis=1, keepdims=True)
    var = jnp.var(x, axis=1, keepdims=True)  # population variance (unbiased=False)
    stdev = jnp.sqrt(var + eps)
    return ((x - mean) / stdev) * w + b, mean, stdev


def _run_case(key, B, L, C):
    x = jax.random.normal(key, (B, L, C), dtype=jnp.float32) * 3.0 + 1.5
    model = RevIN(num_features=C, eps=EPS, affine=True)

    y = model(x, mode="norm")
    y = jax.block_until_ready(y)

    y_ref, mean_ref, std_ref = _ref_norm(x, model.affine_weight, model.affine_bias)
    assert jnp.allclose(y, y_ref, atol=1e-4, rtol=1e-4)
    assert jnp.allclose(model.mean, mean_ref, atol=1e-5, rtol=1e-5)
    assert jnp.allclose(model.stdev, std_ref, atol=1e-5, rtol=1e-5)

    x_rec = model(y, mode="denorm")
    x_rec = jax.block_until_ready(x_rec)
    assert jnp.allclose(x_rec, x, atol=1e-3, rtol=1e-3)


if __name__ == "__main__":
    key = jax.random.PRNGKey(0)
    k1, k2 = jax.random.split(key)

    # Small-C path (channel-major, L on lanes) — matches FedTime's enc_in.
    _run_case(k1, B=2, L=16, C=8)
    # Lane-dense-C path (native (B, L, C) layout, no transpose).
    _run_case(k2, B=2, L=32, C=128)

    print("KERNEL_OK")
</pallas_src>

<mosaic_0001>
module attributes {stable_mosaic.version = 11 : i64} {
  func.func @_revin_norm_kernel(%arg0: i32, %arg1: i32, %arg2: memref<1x8x16xf32, #tpu.memory_space<vmem>>, %arg3: memref<8x1xf32, #tpu.memory_space<vmem>>, %arg4: memref<8x1xf32, #tpu.memory_space<vmem>>, %arg5: memref<1x8x16xf32, #tpu.memory_space<vmem>>, %arg6: memref<1x8x1xf32, #tpu.memory_space<vmem>>, %arg7: memref<1x8x1xf32, #tpu.memory_space<vmem>>) attributes {dimension_semantics = [#tpu.dimension_semantics<parallel>, #tpu.dimension_semantics<parallel>], iteration_bounds = array<i64: 2, 1>, scalar_prefetch = 0 : i64, scratch_operands = 0 : i64, tpu.core_type = #tpu.core_type<tc>, window_params = [{transform_indices = @transform_0, window_bounds = array<i64: 1, 8, 16>}, {transform_indices = @transform_1, window_bounds = array<i64: 8, 1>}, {transform_indices = @transform_2, window_bounds = array<i64: 8, 1>}, {transform_indices = @transform_3, window_bounds = array<i64: 1, 8, 16>}, {transform_indices = @transform_4, window_bounds = array<i64: 1, 8, 1>}, {transform_indices = @transform_5, window_bounds = array<i64: 1, 8, 1>}]} {
    %c0 = arith.constant 0 : index
    %c0_0 = arith.constant 0 : index
    %c0_1 = arith.constant 0 : index
    %0 = vector.load %arg2[%c0, %c0_0, %c0_1] : memref<1x8x16xf32, #tpu.memory_space<vmem>>, vector<1x8x16xf32>
    %1 = vector.shape_cast %0 : vector<1x8x16xf32> to vector<8x16xf32>
    %cst = arith.constant dense<0.000000e+00> : vector<8xf32>
    %2 = vector.multi_reduction <add>, %1, %cst [1] : vector<8x16xf32> to vector<8xf32>
    %3 = vector.shape_cast %2 : vector<8xf32> to vector<8x1xf32>
    %cst_2 = arith.constant 1.600000e+01 : f32
    %4 = vector.broadcast %cst_2 : f32 to vector<8x1xf32>
    %5 = arith.divf %3, %4 : vector<8x1xf32>
    %6 = vector.broadcast %5 : vector<8x1xf32> to vector<8x16xf32>
    %7 = arith.subf %1, %6 : vector<8x16xf32>
    %8 = arith.mulf %7, %7 : vector<8x16xf32>
    %cst_3 = arith.constant dense<0.000000e+00> : vector<8xf32>
    %9 = vector.multi_reduction <add>, %8, %cst_3 [1] : vector<8x16xf32> to vector<8xf32>
    %10 = vector.shape_cast %9 : vector<8xf32> to vector<8x1xf32>
    %cst_4 = arith.constant 1.600000e+01 : f32
    %11 = vector.broadcast %cst_4 : f32 to vector<8x1xf32>
    %12 = arith.divf %10, %11 : vector<8x1xf32>
    %cst_5 = arith.constant 9.99999974E-6 : f32
    %13 = vector.broadcast %cst_5 : f32 to vector<8x1xf32>
    %14 = arith.addf %12, %13 : vector<8x1xf32>
    %15 = math.sqrt %14 : vector<8x1xf32>
    %cst_6 = arith.constant 1.000000e+00 : f32
    %16 = vector.broadcast %cst_6 : f32 to vector<8x1xf32>
    %17 = arith.divf %16, %15 : vector<8x1xf32>
    %c0_7 = arith.constant 0 : index
    %c0_8 = arith.constant 0 : index
    %18 = vector.load %arg3[%c0_7, %c0_8] : memref<8x1xf32, #tpu.memory_space<vmem>>, vector<8x1xf32>
    %19 = arith.mulf %17, %18 : vector<8x1xf32>
    %20 = vector.broadcast %19 : vector<8x1xf32> to vector<8x16xf32>
    %21 = arith.mulf %7, %20 : vector<8x16xf32>
    %c0_9 = arith.constant 0 : index
    %c0_10 = arith.constant 0 : index
    %22 = vector.load %arg4[%c0_9, %c0_10] : memref<8x1xf32, #tpu.memory_space<vmem>>, vector<8x1xf32>
    %23 = vector.broadcast %22 : vector<8x1xf32> to vector<8x16xf32>
    %24 = arith.addf %21, %23 : vector<8x16xf32>
    %c0_11 = arith.constant 0 : index
    %c0_12 = arith.constant 0 : index
    %c0_13 = arith.constant 0 : index
    %25 = vector.load %arg5[%c0_11, %c0_12, %c0_13] : memref<1x8x16xf32, #tpu.memory_space<vmem>>, vector<1x8x16xf32>
    %26 = vector.shape_cast %25 : vector<1x8x16xf32> to vector<8x16xf32>
    %27 = vector.shape_cast %24 : vector<8x16xf32> to vector<1x8x16xf32>
    tpu.vector_store %arg5[%c0_11, %c0_12, %c0_13], %27 {strides = array<i32>} : memref<1x8x16xf32, #tpu.memory_space<vmem>>, vector<1x8x16xf32>,
    %c0_14 = arith.constant 0 : index
    %c0_15 = arith.constant 0 : index
    %c0_16 = arith.constant 0 : index
    %28 = vector.load %arg6[%c0_14, %c0_15, %c0_16] : memref<1x8x1xf32, #tpu.memory_space<vmem>>, vector<1x8x1xf32>
    %29 = vector.shape_cast %28 : vector<1x8x1xf32> to vector<8x1xf32>
    %30 = vector.shape_cast %5 : vector<8x1xf32> to vector<1x8x1xf32>
    tpu.vector_store %arg6[%c0_14, %c0_15, %c0_16], %30 {strides = array<i32>} : memref<1x8x1xf32, #tpu.memory_space<vmem>>, vector<1x8x1xf32>,
    %c0_17 = arith.constant 0 : index
    %c0_18 = arith.constant 0 : index
    %c0_19 = arith.constant 0 : index
    %31 = vector.load %arg7[%c0_17, %c0_18, %c0_19] : memref<1x8x1xf32, #tpu.memory_space<vmem>>, vector<1x8x1xf32>
    %32 = vector.shape_cast %31 : vector<1x8x1xf32> to vector<8x1xf32>
    %33 = vector.shape_cast %15 : vector<8x1xf32> to vector<1x8x1xf32>
    tpu.vector_store %arg7[%c0_17, %c0_18, %c0_19], %33 {strides = array<i32>} : memref<1x8x1xf32, #tpu.memory_space<vmem>>, vector<1x8x1xf32>,
    return
  }
  func.func @transform_0(%arg0: i32, %arg1: i32) -> (i32, i32, i32) {
    %c0_i32 = arith.constant 0 : i32
    %c0_i32_0 = arith.constant 0 : i32
    return %arg0, %arg1, %c0_i32 : i32, i32, i32
  }
  func.func @transform_1(%arg0: i32, %arg1: i32) -> (i32, i32) {
    %c0_i32 = arith.constant 0 : i32
    %c0_i32_0 = arith.constant 0 : i32
    return %arg1, %c0_i32 : i32, i32
  }
  func.func @transform_2(%arg0: i32, %arg1: i32) -> (i32, i32) {
    %c0_i32 = arith.constant 0 : i32
    %c0_i32_0 = arith.constant 0 : i32
    return %arg1, %c0_i32 : i32, i32
  }
  func.func @transform_3(%arg0: i32, %arg1: i32) -> (i32, i32, i32) {
    %c0_i32 = arith.constant 0 : i32
    %c0_i32_0 = arith.constant 0 : i32
    return %arg0, %arg1, %c0_i32 : i32, i32, i32
  }
  func.func @transform_4(%arg0: i32, %arg1: i32) -> (i32, i32, i32) {
    %c0_i32 = arith.constant 0 : i32
    %c0_i32_0 = arith.constant 0 : i32
    return %arg0, %arg1, %c0_i32 : i32, i32, i32
  }
  func.func @transform_5(%arg0: i32, %arg1: i32) -> (i32, i32, i32) {
    %c0_i32 = arith.constant 0 : i32
    %c0_i32_0 = arith.constant 0 : i32
    return %arg0, %arg1, %c0_i32 : i32, i32, i32
  }
}

</mosaic_0001>

<bundles_post_ra>
// kernel: tpu_custom_call.1
= control target key start
LH: loop header
LB: loop body
LE: loop exit
PB: predicated region body
PF: predicated region fallthrough
CT: control target
= control target key end

     0   :  { %11 = vsyncpa [#allocation3], 0  ;;  %s864_s0 = inlined_call_operand.vmem [shape: f32[2,8,16], index: 0, kind: input, shape index: {}]   ;;  %s865_s1 = inlined_call_operand.vmem [shape: f32[8,1], index: 1, kind: input, shape index: {}]   ;;  %s866_s2 = inlined_call_operand.vmem [shape: f32[8,1], index: 2, kind: input, shape index: {}]   ;;  %s867_s3 = inlined_call_operand.hbm [shape: f32[2,8,16], index: 3, kind: output, shape index: {0}]   ;;  %s868_s4 = inlined_call_operand.vmem [shape: f32[2,8,1], index: 4, kind: output, shape index: {1}]   ;;  %s869_s5 = inlined_call_operand.vmem [shape: f32[2,8,1], index: 5, kind: output, shape index: {2}]  }
   0x1   :  { %13 = vsyncpa [#allocation3 + $0x1], 0  ;;  %s743_s18 = smov 0   ;;  %s745_s19 = smov 0  }
   0x2   :  { %s747_s20 = smov 0   ;;  %s749_s21 = smov 0  }
   0x3   :  { %s751_s22 = smov 0   ;;  %s753_s23 = smov 0  }
   0x4 LB: > { %s556_s24 = sadd.s32 4294967295, %s709_s23   ;;  %s557_s25 = sadd.s32 4294967294, %s709_s23   ;;  %s709_s23 = sphi %s753_s23, %s19_s23   ;;  %s705_s22 = sphi %s751_s22, %s876_s22   ;;  %s701_s21 = sphi %s749_s21, %s875_s21   ;;  %s697_s20 = sphi %s747_s20, %s874_s20   ;;  %s693_s19 = sphi %s745_s19, %s873_s19   ;;  %s689_s18 = sphi %s743_s18, %s872_s18  }
   0x5   : > { %s31_s26 = sadd.s32 1, %s705_s22  ;;  %s120_s27 = sadd.s32 1, %s697_s20 }
   0x6   : > { %p33_p0 = scmp.ge.s32.totalorder %s31_s26, 2  ;;  %p130_p1 = scmp.ne.s32.totalorder %s697_s20, %s693_s19 }
   0x7   : > { %p131_p2 = scmp.eq.s32.totalorder %s556_s24, 1  ;;  %p136_p3 = scmp.ne.s32.totalorder %s693_s19, %s689_s18 }
   0x8   : > { %s878_s26 = smov (%p33_p0, %s31_s26), 0  ;;  %p137_p5 = scmp.eq.s32.totalorder %s557_s25, 1 }
   0x9   : > { %p783_p4 = por %p131_p2, %p130_p1  ;;  %s115_s29 = ssub.s32 %s705_s22, %s878_s26 }
   0xa   : > { %p562_p6 = scmp.ge.s32.totalorder %s709_s23, 1  ;;  %p118_p7 = scmp.eq.s32.totalorder %s115_s29, 0 }
   0xb   : > { %p790_p8 = por %p137_p5, %p136_p3  ;;  %p235_p9 = scmp.lt.s32.totalorder %s709_s23, 3 }
   0xc   : > { %s796_s6 = scalar_select %p118_p7, %s697_s20, %s120_s27  }
   0xd   : > { %p236_p10 = pnand %p562_p6, %p235_p9 }
   0xe   : > { %p287_p11 = scmp.lt.s32.totalorder (!%p236_p10), %s701_s21, 1  ;;  %s568_s9 = sshll.u32 (!%p236_p10), %s701_s21, 7 }
   0xf   : > { %239 = sbr.rel (%p236_p10) target bundleno = 490 (0x1ea), region = 32 }
  0x14   : > { %s288_s7 = scalar_select %p287_p11, %s701_s21, 1  ;;  %vm317_vm0 = vcmask 130048   ;;  %vm355_vm1 = vcmask 7168   ;;  %v711_v7 = vmov 0   ;;  %v339_v16 = vld [vmem:[%s865_s1] sm:$0xff] }
  0x15   : > { %627 = vset.pattern.permute.xlu1 %v711_v7  ;;  %628 = vset.pattern.permute.xlu0 %v711_v7  ;;  %v347_v19 = vld [vmem:[%s866_s2] sm:$0xff] }
  0x16   : > { %s800_s8 = sshll.u32 %s288_s7, 3  ;;  %s266_s7 = sand.u32 1, %s693_s19  }
  0x17   : > { %s293_s11 = scalar_lea.vmem %s864_s0, %s800_s8  ;;  %s308_s14 = scalar_lea.vmem %s868_s4, %s800_s8 }
  0x18   : > { %v316_v0 = vld [vmem:[%s293_s11] sm:$0xff]  ;;  %s315_s17 = scalar_lea.vmem %s869_s5, %s800_s8  ;;  %s563_s8 = sshll.u32 %s266_s7, 3 }
  0x19   : > { %v318_v1 = vsel %vm317_vm0, %v316_v0, 0.0  ;;  %s268_s10 = scalar_lea.vmem [#allocation2], %s563_s8  ;;  %s359_s15 = scalar_lea.sflag [#allocation3], %s266_s7 }
  0x1a   : > { %319 = vadd.xlane.f32.xlu0 %v318_v1  ;;  %s387_s11 = sshll.u32 %s268_s10, 4  ;;  %s388_s11 = int_to_ptr.vmem [resolvable:$true] %s387_s11 }
  0x1b   : > { %s633_s16 = scalar_lea.vmem %s388_s11, 128 }
  0x1c   : > { %p634_p12 = scmp.ne.s32.totalorder %s388_s11, %s633_s16 }
  0x1e   : > { %p635_p13 = pnand %p634_p12, %p783_p4 }
  0x20   : > { %p636_p0 = pneg %p635_p13 }
  0xa3   : > { %v320_v2 = vpop.xlane.xlu0 %319 }
  0xa4   : > { %v322_v3 = vmul.f32 0.0625, %v320_v2 }
  0xa6   : > { %v323_v4 = vsub.f32 %v316_v0, %v322_v3  ;;  %356 = vst.msk [vmem:[%s308_s14] sm:$0xff] %vm355_vm1, %v322_v3  ;;  %s385_s14 = scalar_lea.hbm %s867_s3, %s568_s9 }
  0xa8   : > { %v324_v5 = vmul.f32 %v323_v4, %v323_v4 }
  0xaa   : > { %v325_v6 = vsel %vm317_vm0, %v324_v5, 0.0 }
  0xab   : > { %326 = vadd.xlane.f32.xlu0 %v325_v6 }
 0x134   : > { %v327_v8 = vpop.xlane.xlu0 %326 }
 0x135   : > { %v328_v9 = vmul.f32 0.0625, %v327_v8 }
 0x137   : > { %v329_v10 = vadd.f32 1e-05, %v328_v9 }
 0x139   : > { %629 = vrsqrt.f32 %v329_v10  ;;  %vm332_vm2 = vcmp.eq.f32.partialorder %v329_v10, inf  ;;  %v335_v13 = vand.u32 2147483648, %v329_v10  ;;  %vm334_vm3 = vcmp.eq.f32.partialorder %v329_v10, 0.0 }
 0x146   : > { %v630_v11 = vpop.eup %629 }
 0x147   : > { %v331_v12 = vmul.f32 %v630_v11, %v329_v10 }
 0x149   : > { %v333_v14 = vsel %vm332_vm2, %v329_v10, %v331_v12 }
 0x14a   : > { %v336_v15 = vsel %vm334_vm3, %v335_v13, %v333_v14 }
 0x14b   : > { %631 = vrcp.f32 %v336_v15  ;;  %357 = vst.msk [vmem:[%s315_s17] sm:$0xff] %vm355_vm1, %v336_v15  ;;  %s712_s17 = smov [#allocation2]  }
 0x14c   : > { %s637_s21 = sshll.u32 %s712_s17, 4  ;;  %s638_s21 = int_to_ptr.vmem [resolvable:$false] %s637_s21 }
 0x14d   : > { %s639_s24 = scalar_lea.vmem %s638_s21, 256  ;;  %p640_p1 = scmp.lt.s32.totalorder %s388_s11, %s638_s21 }
 0x14e   : > { %p641_p2 = scmp.lt.s32.totalorder %s639_s24, %s633_s16 }
 0x150   : > { %p642_p3 = por %p641_p2, %p640_p1 }
 0x152   : > { %p643_p5 = pnand %p642_p3, %p636_p0 }
 0x158   : > { %v632_v17 = vpop.eup %631 }
 0x159   : > { %v340_v18 = vmul.f32 %v632_v17, %v339_v16 }
 0x15b   : > { %343 = vperm.xlu1 %627, %v340_v18  }
 0x15f   : > { %350 = vperm.xlu1 %627, %v347_v19  }
 0x1d6   : > { %v344_v20 = vpop.permute.xlu1 %343 }
 0x1d7   : > { %v346_v21 = vmul.f32 %v344_v20, %v323_v4 }
 0x1da   : > { %v351_v22 = vpop.permute.xlu1 %350 }
 0x1db   : > { %v353_v23 = vadd.f32 %v351_v22, %v346_v21 }
 0x1dd   : > { %354 = vst.msk [vmem:[%s268_s10] sm:$0xff] %vm317_vm0, %v353_v23 }
 0x1de   : > { %646 = shalt.err (!%p643_p5)
}
 0x1df   : > { %s647_s25 = scalar_lea.hbm %s385_s14, 128  ;;  %s651_s7 = scalar_lea.hbm %s867_s3, 256 }
 0x1e0   : > { %p648_p6 = scmp.ne.s32.totalorder %s385_s14, %s647_s25  ;;  %p652_p10 = scmp.lt.s32.totalorder %s385_s14, %s867_s3 }
 0x1e1   : > { %p653_p11 = scmp.lt.s32.totalorder %s651_s7, %s647_s25 }
 0x1e2   : > { %p649_p7 = pnand %p648_p6, %p783_p4 }
 0x1e3   : > { %p654_p12 = por %p653_p11, %p652_p10 }
 0x1e4   : > { %p650_p9 = pneg %p649_p7 }
 0x1e6   : > { %p655_p13 = pnand %p654_p12, %p650_p9 }
 0x1e8   : > { %658 = shalt.err (!%p655_p13)
}
 0x1e9   : > { %571 = dma.vmem_to_hbm [thread:$0]  (%p783_p4), %s388_s11, 128, %s385_s14, %s359_s15  }
 0x1ea PF: > { %p577_p0 = scmp.ge.s32.totalorder %s709_s23, 2  ;;  %s405_s10 = sand.u32 1, %s689_s18  }
 0x1eb   : > { %s406_s12 = scalar_lea.sflag [#allocation3], %s405_s10 }
 0x1ec   : > { %p574_p1 = pnand %p577_p0, %p790_p8 }
 0x1ee   : > { %p575_p2 = pneg %p574_p1 }
 0x1f0   : > { %684 = dma.done.wait (%p575_p2), %s406_s12, 128  }
 0x1f1   : > { %686 = vsyncadd (%p575_p2), %s406_s12, 4294967168  ;;  %s19_s23 = sadd.s32 1, %s709_s23   ;;  %s872_s18 = smov %s693_s19 }
 0x1f2   : > { %p16_p3 = scmp.ge.s32.totalorder %s19_s23, 4   ;;  %s873_s19 = smov %s697_s20 }
 0x1f3   : > { %s874_s20 = smov %s796_s6  ;;  %s875_s21 = smov %s705_s22 }
 0x1f4   : > { %s876_s22 = smov %s878_s26  ;;  %18 = sbr.rel (!%p16_p3) target bundleno = 4 (0x4), region = 97 }
 0x1f9   :  { %431 = vsyncpa [#allocation3], 1 }
 0x1fa   :  { %433 = vsyncpa [#allocation3 + $0x1], 1 }

</bundles_post_ra>
